<compile_context>
chip_gen: v5e
topology: v5e:2x2
jax: 0.10.0
libtpu: 0.0.40
codegen_flags: <defaults>
</compile_context>

<pallas_src>
import functools

import jax
import jax.numpy as jnp
from jax import lax
from jax.experimental import pallas as pl
from jax.experimental.pallas import tpu as pltpu

ALPHA = 0.25
GAMMA = 2
LANES = 128
NUM_PARTIALS = 2                       # leading "parallel" axis: one partial per TensorCore (v7x)
BLOCK_BYTES_BUDGET = 4 * 1024 * 1024   # combined inputs+targets bytes streamed per grid step


def _round_up(v, m):
    return ((v + m - 1) // m) * m


def _bce_partial_kernel(x_ref, t_ref, o_ref, *, row_tile, n,
                        blocks_total, blocks_per_core):
    """Accumulate per-core partial sums of per-element BCE into an (8,128) block."""
    c = pl.program_id(0)   # partial-sum / TensorCore axis ("parallel")
    i = pl.program_id(1)   # reduction axis ("arbitrary")

    @pl.when(i == 0)
    def _():
        o_ref[...] = jnp.zeros_like(o_ref)

    x = x_ref[...].astype(jnp.float32)
    t = t_ref[...].astype(jnp.float32)

    # Per-element binary cross entropy.  PyTorch's F.binary_cross_entropy clamps
    # each log term at -100; do the same for exact parity (soft labels supported).
    log_p = jnp.maximum(jnp.log(x), -100.0)
    log_1mp = jnp.maximum(jnp.log(1.0 - x), -100.0)
    bce = -(t * log_p + (1.0 - t) * log_1mp)

    gblock = c * blocks_per_core + i
    # Masking is only needed on the (single) ragged tail block and on the fully
    # out-of-range duplicate blocks handed to the second partial.
    needs_mask = gblock >= blocks_total - 1

    @pl.when(jnp.logical_not(needs_mask))
    def _():
        # Fold (row_tile,128) into the (8,128) output block with pure VPU adds;
        # the expensive cross-lane reduce happens once in the wrapper.
        o_ref[...] += bce.reshape(row_tile // 8, 8, LANES).sum(axis=0)

    @pl.when(needs_mask)
    def _():
        base = gblock * (row_tile * LANES)
        ridx = lax.broadcasted_iota(jnp.int32, (row_tile, LANES), 0)
        cidx = lax.broadcasted_iota(jnp.int32, (row_tile, LANES), 1)
        valid = (base + ridx * LANES + cidx) < n
        o_ref[...] += jnp.where(valid, bce, 0.0).reshape(
            row_tile // 8, 8, LANES).sum(axis=0)


def focal_loss_pallas(inputs, targets, alpha=ALPHA, gamma=GAMMA,
                      block_bytes=BLOCK_BYTES_BUDGET):
    """Pallas TPU implementation of FocalLoss.forward.  Returns a scalar f32."""
    x = inputs.reshape(-1)
    t = targets.reshape(-1)
    n = x.shape[0]
    if n == 0:
        # F.binary_cross_entropy(reduction='mean') of an empty tensor is NaN.
        return jnp.float32(jnp.nan)

    # Lane-dense 2-D slab (rows, 128).  Only an N % 128 != 0 tail needs a
    # wrapper-side pad (<=127 elements); the padded lanes (and any partial-block
    # overhang) are masked out in-kernel, so the pad value is irrelevant.
    rows = (n + LANES - 1) // LANES
    n128 = rows * LANES
    if n128 != n:
        pad = n128 - n
        x = jnp.concatenate([x, jnp.full((pad,), 0.5, x.dtype)])
        t = jnp.concatenate([t, jnp.full((pad,), 0.5, t.dtype)])
    x2 = x.reshape(rows, LANES)
    t2 = t.reshape(rows, LANES)

    # Sublane granule for the block row count: 8 (32-bit), 16 (16-bit), 32 (8-bit).
    granule = max(8, 32 // x2.dtype.itemsize, 32 // t2.dtype.itemsize)
    bytes_per_row = LANES * (x2.dtype.itemsize + t2.dtype.itemsize)
    row_cap = max(granule, (block_bytes // bytes_per_row) // granule * granule)
    row_tile = min(row_cap, _round_up(rows, granule))

    blocks_total = (rows + row_tile - 1) // row_tile         # partial last block allowed
    blocks_per_core = (blocks_total + NUM_PARTIALS - 1) // NUM_PARTIALS
    grid = (NUM_PARTIALS, blocks_per_core)

    def in_map(c, i):
        # Clamp duplicate / out-of-range blocks of the second partial; their
        # contribution is masked to zero in-kernel.
        return (jnp.minimum(c * blocks_per_core + i, blocks_total - 1), 0)

    kernel = functools.partial(
        _bce_partial_kernel, row_tile=row_tile, n=n,
        blocks_total=blocks_total, blocks_per_core=blocks_per_core)

    partials = pl.pallas_call(
        kernel,
        out_shape=jax.ShapeDtypeStruct((NUM_PARTIALS * 8, LANES), jnp.float32),
        grid_spec=pltpu.PrefetchScalarGridSpec(
            num_scalar_prefetch=0,
            grid=grid,
            in_specs=[
                # TODO(synk): if DMA is still exposed on v7x, add
                # pipeline_mode=pl.Buffered(3) to these two specs.
                pl.BlockSpec((row_tile, LANES), in_map),
                pl.BlockSpec((row_tile, LANES), in_map),
            ],
            out_specs=pl.BlockSpec((8, LANES), lambda c, i: (c, 0)),
        ),
        compiler_params=pltpu.CompilerParams(
            dimension_semantics=("parallel", "arbitrary"),
            vmem_limit_bytes=32 * 1024 * 1024,
        ),
        cost_estimate=pl.CostEstimate(
            flops=8 * rows * LANES,
            transcendentals=2 * rows * LANES,
            bytes_accessed=rows * bytes_per_row + NUM_PARTIALS * 8 * LANES * 4,
        ),
    )(x2, t2)

    # Scalar finalize (a handful of XLA scalar ops): combine the partial sums.
    bce_mean = jnp.sum(partials) / jnp.float32(n)
    one_minus = 1.0 - jnp.exp(-bce_mean)
    if gamma == 2:
        modulator = one_minus * one_minus       # explicit square: avoid pow for default gamma
    else:
        modulator = one_minus ** gamma
    return (alpha * modulator * bce_mean).astype(jnp.float32)


def focal_loss_ref(inputs, targets, alpha=ALPHA, gamma=GAMMA):
    p = inputs.reshape(-1).astype(jnp.float32)
    t = targets.reshape(-1).astype(jnp.float32)
    bce = jnp.mean(-(t * jnp.maximum(jnp.log(p), -100.0)
                     + (1.0 - t) * jnp.maximum(jnp.log(1.0 - p), -100.0)))
    return alpha * (1.0 - jnp.exp(-bce)) ** gamma * bce


if __name__ == "__main__":
    key = jax.random.PRNGKey(0)
    k1, k2, k3, k4, k5, k6 = jax.random.split(key, 6)

    # 1) NCHW-shaped inputs matching the module's typical usage:
    #    2*4*16*16 = 2048 elements = 16 rows x 128 lanes.
    shape = (2, 4, 16, 16)
    inputs = jax.nn.sigmoid(jax.random.normal(k1, shape, dtype=jnp.float32))
    targets = (jax.random.uniform(k2, shape) > 0.5).astype(jnp.float32)
    out = jax.block_until_ready(focal_loss_pallas(inputs, targets))
    ref = focal_loss_ref(inputs, targets)
    assert jnp.allclose(out, ref, rtol=1e-5, atol=1e-6), (out, ref)

    # 2) Ragged size (210 elements): exercises the 128-pad + in-kernel tail mask
    #    and the clamped duplicate block of the second partial.
    shape2 = (2, 3, 7, 5)
    inputs2 = jax.nn.sigmoid(jax.random.normal(k3, shape2, dtype=jnp.float32))
    targets2 = (jax.random.uniform(k4, shape2) > 0.5).astype(jnp.float32)
    out2 = jax.block_until_ready(focal_loss_pallas(inputs2, targets2))
    ref2 = focal_loss_ref(inputs2, targets2)
    assert jnp.allclose(out2, ref2, rtol=1e-5, atol=1e-6), (out2, ref2)

    # 3) Multi-block path with both partials doing real work: small shape but a
    #    tiny forced block budget so grid = (2, 2) is exercised.
    shape3 = (2, 4, 32, 32)  # 8192 elements = 64 rows
    inputs3 = jax.nn.sigmoid(jax.random.normal(k5, shape3, dtype=jnp.float32))
    targets3 = (jax.random.uniform(k6, shape3) > 0.5).astype(jnp.float32)
    out3 = jax.block_until_ready(
        focal_loss_pallas(inputs3, targets3, block_bytes=16 * 1024))
    ref3 = focal_loss_ref(inputs3, targets3)
    assert jnp.allclose(out3, ref3, rtol=1e-5, atol=1e-6), (out3, ref3)

    # 4) bf16 inputs stream half the HBM bytes; accumulation stays f32 in-kernel.
    inputs4 = inputs.astype(jnp.bfloat16)
    targets4 = targets.astype(jnp.bfloat16)
    out4 = jax.block_until_ready(focal_loss_pallas(inputs4, targets4))
    ref4 = focal_loss_ref(inputs4, targets4)
    assert jnp.allclose(out4, ref4, rtol=1e-3, atol=1e-4), (out4, ref4)

    print("KERNEL_OK")
</pallas_src>

<mosaic_0001>
module attributes {stable_mosaic.version = 11 : i64} {
  func.func @_bce_partial_kernel(%arg0: i32, %arg1: i32, %arg2: memref<16x128xf32, #tpu.memory_space<vmem>>, %arg3: memref<16x128xf32, #tpu.memory_space<vmem>>, %arg4: memref<8x128xf32, #tpu.memory_space<vmem>>) attributes {dimension_semantics = [#tpu.dimension_semantics<parallel>, #tpu.dimension_semantics<arbitrary>], iteration_bounds = array<i64: 2, 1>, scalar_prefetch = 0 : i64, scratch_operands = 0 : i64, tpu.core_type = #tpu.core_type<tc>, window_params = [{transform_indices = @transform_0, window_bounds = array<i64: 16, 128>}, {transform_indices = @transform_1, window_bounds = array<i64: 16, 128>}, {transform_indices = @transform_2, window_bounds = array<i64: 8, 128>}]} {
    %c0_i32 = arith.constant 0 : i32
    %0 = arith.cmpi eq, %arg1, %c0_i32 : i32
    %1 = arith.extui %0 : i1 to i32
    %c0_i32_0 = arith.constant 0 : i32
    %2 = arith.cmpi ne, %1, %c0_i32_0 : i32
    scf.if %2 {
      %cst_11 = arith.constant 0.000000e+00 : f32
      %28 = vector.broadcast %cst_11 : f32 to vector<8x128xf32>
      %c0_12 = arith.constant 0 : index
      %c0_13 = arith.constant 0 : index
      %29 = vector.load %arg4[%c0_12, %c0_13] : memref<8x128xf32, #tpu.memory_space<vmem>>, vector<8x128xf32>
      tpu.vector_store %arg4[%c0_12, %c0_13], %28 {strides = array<i32>} : memref<8x128xf32, #tpu.memory_space<vmem>>, vector<8x128xf32>,
    } else {
    }
    %c0 = arith.constant 0 : index
    %c0_1 = arith.constant 0 : index
    %3 = vector.load %arg2[%c0, %c0_1] : memref<16x128xf32, #tpu.memory_space<vmem>>, vector<16x128xf32>
    %c0_2 = arith.constant 0 : index
    %c0_3 = arith.constant 0 : index
    %4 = vector.load %arg3[%c0_2, %c0_3] : memref<16x128xf32, #tpu.memory_space<vmem>>, vector<16x128xf32>
    %5 = math.log %3 : vector<16x128xf32>
    %cst = arith.constant -1.000000e+02 : f32
    %6 = vector.broadcast %cst : f32 to vector<16x128xf32>
    %7 = arith.maximumf %5, %6 : vector<16x128xf32>
    %cst_4 = arith.constant 1.000000e+00 : f32
    %8 = vector.broadcast %cst_4 : f32 to vector<16x128xf32>
    %9 = arith.subf %8, %3 : vector<16x128xf32>
    %10 = math.log %9 : vector<16x128xf32>
    %cst_5 = arith.constant -1.000000e+02 : f32
    %11 = vector.broadcast %cst_5 : f32 to vector<16x128xf32>
    %12 = arith.maximumf %10, %11 : vector<16x128xf32>
    %13 = arith.mulf %4, %7 : vector<16x128xf32>
    %cst_6 = arith.constant 1.000000e+00 : f32
    %14 = vector.broadcast %cst_6 : f32 to vector<16x128xf32>
    %15 = arith.subf %14, %4 : vector<16x128xf32>
    %16 = arith.mulf %15, %12 : vector<16x128xf32>
    %17 = arith.addf %13, %16 : vector<16x128xf32>
    %cst_7 = arith.constant 0.000000e+00 : f32
    %18 = vector.broadcast %cst_7 : f32 to vector<16x128xf32>
    %19 = arith.subf %18, %17 : vector<16x128xf32>
    %c1_i32 = arith.constant 1 : i32
    %20 = arith.muli %arg0, %c1_i32 : i32
    %21 = arith.addi %20, %arg1 : i32
    %c0_i32_8 = arith.constant 0 : i32
    %22 = arith.cmpi sge, %21, %c0_i32_8 : i32
    %true = arith.constant true
    %23 = arith.xori %22, %true : i1
    %24 = arith.extui %23 : i1 to i32
    %c0_i32_9 = arith.constant 0 : i32
    %25 = arith.cmpi ne, %24, %c0_i32_9 : i32
    scf.if %25 {
      %c0_11 = arith.constant 0 : index
      %c0_12 = arith.constant 0 : index
      %28 = vector.load %arg4[%c0_11, %c0_12] : memref<8x128xf32, #tpu.memory_space<vmem>>, vector<8x128xf32>
      %29 = vector.shape_cast %19 : vector<16x128xf32> to vector<2x8x128xf32>
      %cst_13 = arith.constant dense<0.000000e+00> : vector<8x128xf32>
      %30 = vector.multi_reduction <add>, %29, %cst_13 [0] : vector<2x8x128xf32> to vector<8x128xf32>
      %31 = arith.addf %28, %30 : vector<8x128xf32>
      %c0_14 = arith.constant 0 : index
      %c0_15 = arith.constant 0 : index
      %32 = vector.load %arg4[%c0_14, %c0_15] : memref<8x128xf32, #tpu.memory_space<vmem>>, vector<8x128xf32>
      tpu.vector_store %arg4[%c0_14, %c0_15], %31 {strides = array<i32>} : memref<8x128xf32, #tpu.memory_space<vmem>>, vector<8x128xf32>,
    } else {
    }
    %26 = arith.extui %22 : i1 to i32
    %c0_i32_10 = arith.constant 0 : i32
    %27 = arith.cmpi ne, %26, %c0_i32_10 : i32
    scf.if %27 {
      %c2048_i32 = arith.constant 2048 : i32
      %28 = arith.muli %21, %c2048_i32 : i32
      %29 = tpu.iota {dimensions = array<i32: 0>} : vector<16x128xi32>
      %30 = tpu.iota {dimensions = array<i32: 1>} : vector<16x128xi32>
      %c128_i32 = arith.constant 128 : i32
      %31 = vector.broadcast %c128_i32 : i32 to vector<16x128xi32>
      %32 = arith.muli %29, %31 : vector<16x128xi32>
      %33 = vector.broadcast %28 : i32 to vector<16x128xi32>
      %34 = arith.addi %33, %32 : vector<16x128xi32>
      %35 = arith.addi %34, %30 : vector<16x128xi32>
      %c2048_i32_11 = arith.constant 2048 : i32
      %36 = vector.broadcast %c2048_i32_11 : i32 to vector<16x128xi32>
      %37 = arith.cmpi slt, %35, %36 : vector<16x128xi32>
      %c0_12 = arith.constant 0 : index
      %c0_13 = arith.constant 0 : index
      %38 = vector.load %arg4[%c0_12, %c0_13] : memref<8x128xf32, #tpu.memory_space<vmem>>, vector<8x128xf32>
      %cst_14 = arith.constant 0.000000e+00 : f32
      %39 = vector.broadcast %cst_14 : f32 to vector<16x128xf32>
      %40 = arith.select %37, %19, %39 : vector<16x128xi1>, vector<16x128xf32>
      %41 = vector.shape_cast %40 : vector<16x128xf32> to vector<2x8x128xf32>
      %cst_15 = arith.constant dense<0.000000e+00> : vector<8x128xf32>
      %42 = vector.multi_reduction <add>, %41, %cst_15 [0] : vector<2x8x128xf32> to vector<8x128xf32>
      %43 = arith.addf %38, %42 : vector<8x128xf32>
      %c0_16 = arith.constant 0 : index
      %c0_17 = arith.constant 0 : index
      %44 = vector.load %arg4[%c0_16, %c0_17] : memref<8x128xf32, #tpu.memory_space<vmem>>, vector<8x128xf32>
      tpu.vector_store %arg4[%c0_16, %c0_17], %43 {strides = array<i32>} : memref<8x128xf32, #tpu.memory_space<vmem>>, vector<8x128xf32>,
    } else {
    }
    return
  }
  func.func @transform_0(%arg0: i32, %arg1: i32) -> (i32, i32) {
    %c1_i32 = arith.constant 1 : i32
    %0 = arith.muli %arg0, %c1_i32 : i32
    %1 = arith.addi %0, %arg1 : i32
    %c0_i32 = arith.constant 0 : i32
    %2 = arith.minsi %1, %c0_i32 : i32
    %c0_i32_0 = arith.constant 0 : i32
    %c0_i32_1 = arith.constant 0 : i32
    return %2, %c0_i32_0 : i32, i32
  }
  func.func @transform_1(%arg0: i32, %arg1: i32) -> (i32, i32) {
    %c1_i32 = arith.constant 1 : i32
    %0 = arith.muli %arg0, %c1_i32 : i32
    %1 = arith.addi %0, %arg1 : i32
    %c0_i32 = arith.constant 0 : i32
    %2 = arith.minsi %1, %c0_i32 : i32
    %c0_i32_0 = arith.constant 0 : i32
    %c0_i32_1 = arith.constant 0 : i32
    return %2, %c0_i32_0 : i32, i32
  }
  func.func @transform_2(%arg0: i32, %arg1: i32) -> (i32, i32) {
    %c0_i32 = arith.constant 0 : i32
    %c0_i32_0 = arith.constant 0 : i32
    return %arg0, %c0_i32 : i32, i32
  }
}

</mosaic_0001>

<bundles_post_ra>
// kernel: tpu_custom_call.1
= control target key start
LH: loop header
LB: loop body
LE: loop exit
PB: predicated region body
PF: predicated region fallthrough
CT: control target
= control target key end

     0   :  { %7 = vsyncpa [#allocation3], 0  ;;  %s925_s0 = inlined_call_operand.hbm [shape: f32[16,128], index: 0, kind: input, shape index: {}]   ;;  %s926_s1 = inlined_call_operand.hbm [shape: f32[16,128], index: 1, kind: input, shape index: {}]   ;;  %s927_s2 = inlined_call_operand.hbm [shape: f32[16,128], index: 2, kind: output, shape index: {}]  }
   0x1   :  { %9 = vsyncpa [#allocation3 + $0x1], 0 }
   0x2   :  { %10 = vsyncpa [#allocation6], 0 }
   0x3   :  { %12 = vsyncpa [#allocation6 + $0x1], 0 }
   0x4   :  { %13 = vsyncpa [#allocation4], 0 }
   0x5   :  { %15 = vsyncpa [#allocation4 + $0x1], 0  ;;  %s742_s9 = smov 0   ;;  %s744_s10 = smov 0  }
   0x6   :  { %s746_s11 = smov 0   ;;  %s748_s12 = smov 0  }
   0x7   :  { %s750_s13 = smov 0   ;;  %s752_s14 = smov 0  }
   0x8   :  { %s754_s15 = smov 0   ;;  %s756_s16 = smov 0  }
   0x9 LB: > { %s428_s17 = sadd.s32 4294967295, %s720_s16   ;;  %s429_s18 = sadd.s32 4294967294, %s720_s16   ;;  %s720_s16 = sphi %s756_s16, %s21_s16   ;;  %s716_s15 = sphi %s754_s15, %s939_s15   ;;  %s712_s14 = sphi %s752_s14, %s938_s14   ;;  %s708_s13 = sphi %s750_s13, %s915_s13   ;;  %s704_s12 = sphi %s748_s12, %s937_s12   ;;  %s700_s11 = sphi %s746_s11, %s936_s11   ;;  %s696_s10 = sphi %s744_s10, %s935_s10   ;;  %s692_s9 = sphi %s742_s9, %s934_s9  }
   0xa   : > { %s33_s19 = sadd.s32 1, %s716_s15  ;;  %p689_p1 = scmp.ne.s32.totalorder %s708_s13, 0 }
   0xb   : > { %p35_p0 = scmp.ge.s32.totalorder %s33_s19, 2  ;;  %p54_p2 = scmp.eq.s32.totalorder %s720_s16, 0 }
   0xc   : > { %p59_p3 = scmp.ne.s32.totalorder %s708_s13, %s704_s12  ;;  %p60_p5 = scmp.eq.s32.totalorder %s428_s17, 0 }
   0xd   : > { %s941_s19 = smov (%p35_p0, %s33_s19), 0  ;;  %p788_p4 = por %p689_p1, %p54_p2 }
   0xe   : > { %p792_p6 = por %p60_p5, %p59_p3  ;;  %s101_s22 = ssub.s32 %s716_s15, %s941_s19 }
   0xf   : > { %p102_p7 = scmp.eq.s32.totalorder %s101_s22, 0  ;;  %s104_s23 = sadd.s32 1, %s700_s11 }
  0x10   : > { %p114_p8 = scmp.ne.s32.totalorder %s700_s11, %s696_s10  ;;  %p115_p9 = scmp.eq.s32.totalorder %s428_s17, 1 }
  0x11   : > { %s800_s24 = scalar_select %p102_p7, %s700_s11, %s104_s23  }
  0x12   : > { %p120_p10 = scmp.ne.s32.totalorder %s696_s10, %s692_s9  ;;  %p121_p11 = scmp.eq.s32.totalorder %s429_s18, 1 }
  0x13   : > { %p806_p12 = por %p115_p9, %p114_p8  ;;  %p431_p13 = scmp.ge.s32.totalorder %s720_s16, 2 }
  0x14   : > { %p811_p0 = por %p121_p11, %p120_p10  ;;  %p468_p1 = scmp.lt.s32.totalorder %s720_s16, 2 }
  0x15   : > { %s154_s29 = sshll.u32 %s925_s0, 4  ;;  %s722_s30 = smov [#allocation2]   ;;  %s155_s29 = int_to_ptr.hbm [resolvable:$true] %s154_s29 }
  0x16   : > { %s156_s3 = sshll.u32 %s722_s30, 4  ;;  %p821_p2 = pnand %p468_p1, %p788_p4  ;;  %s157_s3 = int_to_ptr.vmem [resolvable:$true] %s156_s3 }
  0x17   : > { %p438_p3 = scmp.ge.s32.totalorder %s720_s16, 1  ;;  %p189_p5 = scmp.lt.s32.totalorder %s720_s16, 3 }
  0x18   : > { %s553_s5 = sshra.s32 %s155_s29, 4  ;;  %p557_p8 = pneg %p821_p2  ;;  %s554_s5 = int_to_ptr.hbm [resolvable:$true] %s553_s5 }
  0x19   : > { %s555_s6 = scalar_lea.hbm %s554_s5, 16  ;;  %s560_s12 = scalar_lea.hbm %s925_s0, 16 }
  0x1a   : > { %p556_p7 = scmp.ne.s32.totalorder %s554_s5, %s555_s6  ;;  %p562_p4 = scmp.lt.s32.totalorder %s560_s12, %s555_s6 }
  0x1c   : > { %p558_p9 = pnand %p557_p8, %p556_p7 }
  0x1e   : > { %p559_p10 = pneg %p558_p9 }
  0x20   : > { %p564_p11 = pnand %p562_p4, %p559_p10 }
  0x22   : > { %567 = shalt.err (!%p564_p11)
}
  0x23   : > { %s723_s17 = smov 128   ;;  %s724_s18 = smov 8  }
  0x24   : > { %460 = dma.hbm_to_vmem [thread:$0]  (!%p821_p2), %s155_s29, 256, %s157_s3, [#allocation3], %s723_s17, %s723_s17, %s724_s18  }
  0x25   : > { %p841_p1 = pnand %p438_p3, %p189_p5  ;;  %s179_s27 = sshll.u32 %s926_s1, 4  ;;  %s180_s27 = int_to_ptr.hbm [resolvable:$true] %s179_s27 }
  0x26   : > { %s725_s28 = smov [#allocation5]   ;;  %s583_s5 = sshra.s32 %s180_s27, 4  ;;  %s584_s5 = int_to_ptr.hbm [resolvable:$true] %s583_s5 }
  0x27   : > { %s181_s30 = sshll.u32 %s725_s28, 4  ;;  %s585_s6 = scalar_lea.hbm %s584_s5, 16  ;;  %s182_s30 = int_to_ptr.vmem [resolvable:$true] %s181_s30 }
  0x28   : > { %p586_p7 = scmp.ne.s32.totalorder %s584_s5, %s585_s6  ;;  %s590_s7 = scalar_lea.hbm %s926_s1, 16 }
  0x29   : > { %p592_p3 = scmp.lt.s32.totalorder %s590_s7, %s585_s6 }
  0x2a   : > { %p588_p9 = pnand %p586_p7, %p557_p8 }
  0x2c   : > { %p589_p10 = pneg %p588_p9 }
  0x2e   : > { %p594_p5 = pnand %p592_p3, %p589_p10 }
  0x30   : > { %597 = shalt.err (!%p594_p5)
}
  0x31   : > { %463 = dma.hbm_to_vmem [thread:$0]  (!%p821_p2), %s180_s27, 256, %s182_s30, [#allocation6], %s723_s17, %s723_s17, %s724_s18  }
  0x32   : > { %193 = sbr.rel (%p841_p1) target bundleno = 125 (0x7d), region = 28  ;;  %s195_s8 = sand.u32 (!%p841_p1), 1, %s708_s13  }
  0x33   : > { %s439_s12 = sshll.u32 (!%p841_p1), %s195_s8, 4  ;;  %s196_s22 = scalar_lea.sflag (!%p841_p1), [#allocation3], %s195_s8 }
  0x34   : > { %s199_s23 = scalar_lea.vmem (!%p841_p1), [#allocation2], %s439_s12 }
  0x37   : > { %678 = dma.done.wait (%p792_p6), %s196_s22, 256  }
  0x38   : > { %680 = vsyncadd (%p792_p6), %s196_s22, 4294967040  ;;  %s206_s28 = scalar_lea.sflag [#allocation6], %s195_s8  ;;  %s209_s5 = scalar_lea.vmem [#allocation5], %s439_s12 }
  0x39   : > { %682 = dma.done.wait (%p792_p6), %s206_s28, 256  }
  0x3a   : > { %684 = vsyncadd (%p792_p6), %s206_s28, 4294967040  ;;  %s233_s4 = sand.u32 1, %s696_s10   ;;  %v726_v0 = vmov 0.0   ;;  %v249_v1 = vld [vmem:[%s199_s23] sm:$0xff]  ;;  %v250_v2 = vld [vmem:[%s199_s23 + $0x8] sm:$0xff]  ;;  %p442_p6 = scmp.ge.s32.totalorder %s712_s14, 0 }
  0x3b   : > { %s441_s17 = sshll.u32 %s233_s4, 3  ;;  %545 = vlog2.f32 %v249_v1  ;;  %v259_v3 = vsub.f32 1.0, %v249_v1  ;;  %v260_v4 = vsub.f32 1.0, %v250_v2  ;;  %v251_v6 = vld [vmem:[%s209_s5] sm:$0xff]  ;;  %v252_v8 = vld [vmem:[%s209_s5 + $0x8] sm:$0xff] }
  0x3c   : > { %s870_s18 = scalar_lea.vmem [#allocation7], %s441_s17  ;;  %547 = vlog2.f32 %v250_v2  ;;  %v269_v15 = vsub.f32 1.0, %v251_v6  ;;  %v270_v18 = vsub.f32 1.0, %v252_v8 }
  0x3d   : > { %248 = vst [vmem:[%s870_s18] sm:$0xff] %v726_v0  ;;  %549 = vlog2.f32 %v259_v3 }
  0x3e   : > { %551 = vlog2.f32 %v260_v4 }
  0x41   : > { %v546_v5 = vpop.eup %545 }
  0x42   : > { %v548_v7 = vpop.eup %547  ;;  %v254_v9 = vmul.f32 0.6931472, %v546_v5 }
  0x43   : > { %v550_v10 = vpop.eup %549  ;;  %v256_v11 = vmul.f32 0.6931472, %v548_v7 }
  0x44   : > { %v552_v12 = vpop.eup %551  ;;  %v257_v13 = vmax.f32 %v254_v9, -100.0  ;;  %v262_v14 = vmul.f32 0.6931472, %v550_v10 }
  0x45   : > { %v258_v16 = vmax.f32 %v256_v11, -100.0  ;;  %v264_v17 = vmul.f32 0.6931472, %v552_v12 }
  0x46   : > { %v265_v19 = vmax.f32 %v262_v14, -100.0  ;;  %v267_v20 = vmul.f32 %v257_v13, %v251_v6 }
  0x47   : > { %v266_v21 = vmax.f32 %v264_v17, -100.0  ;;  %v268_v22 = vmul.f32 %v258_v16, %v252_v8 }
  0x48   : > { %v271_v23 = vmul.f32 %v269_v15, %v265_v19 }
  0x49   : > { %v272_v24 = vmul.f32 %v270_v18, %v266_v21  ;;  %282 = sbr.rel (%p442_p6) target bundleno = 84 (0x54), region = 44 }
  0x4a   : > { %v273_v25 = vadd.f32 %v271_v23, %v267_v20 }
  0x4b   : > { %v274_v26 = vadd.f32 %v272_v24, %v268_v22 }
  0x4c   : > { %v275_v27 = vsub.f32 0.0, %v273_v25 }
  0x4d   : > { %v276_v28 = vsub.f32 0.0, %v274_v26 }
  0x4e   : > { %v283_v29 = vld [vmem:[%s870_s18] sm:$0xff] }
  0x4f   : > { %v284_v30 = vadd.f32 %v276_v28, %v275_v27 }
  0x51   : > { %v285_v31 = vadd.f32 %v284_v30, %v283_v29 }
  0x53   : > { %286 = vst [vmem:[%s870_s18] sm:$0xff] %v285_v31 }
  0x54 PF: > { %p443_p2 = scmp.lt.s32.totalorder %s712_s14, 0 }
  0x55   : > { %s444_s21 = sshll.u32 (!%p443_p2), %s712_s14, 11 }
  0x56   : > { %289 = sbr.rel (%p443_p2) target bundleno = 110 (0x6e), region = 48 }
  0x5b   : > { %v291_v32 = vlaneseq  ;;  %v298_v34 = vstv %s444_s21  ;;  %v305_v44 = vld [vmem:[%s870_s18] sm:$0xff] }
  0x5d   : > { %v292_v33 = vshrl.u32 %v291_v32, 7  ;;  %v295_v36 = vand.u32 127, %v291_v32 }
  0x5f   : > { %v293_v35 = vadd.s32 8, %v292_v33  ;;  %v296_v37 = vmul.u32 128, %v292_v33 }
  0x61   : > { %v297_v38 = vmul.u32 128, %v293_v35  ;;  %v299_v39 = vadd.s32 %v298_v34, %v296_v37 }
  0x63   : > { %v300_v40 = vadd.s32 %v298_v34, %v297_v38  ;;  %v301_v41 = vadd.s32 %v299_v39, %v295_v36 }
  0x65   : > { %v302_v42 = vadd.s32 %v300_v40, %v295_v36  ;;  %vm303_vm0 = vcmp.lt.s32.totalorder %v301_v41, 2048 }
  0x66   : > { %v306_v43 = vsel %vm303_vm0, %v275_v27, 0.0 }
  0x67   : > { %vm304_vm1 = vcmp.lt.s32.totalorder %v302_v42, 2048 }
  0x68   : > { %v307_v45 = vsel %vm304_vm1, %v276_v28, 0.0 }
  0x69   : > { %v308_v46 = vadd.f32 %v307_v45, %v306_v43 }
  0x6b   : > { %v309_v47 = vadd.f32 %v308_v46, %v305_v44 }
  0x6d   : > { %310 = vst [vmem:[%s870_s18] sm:$0xff] %v309_v47 }
  0x6e PF: > { %s446_s20 = sshll.u32 %s712_s14, 3  ;;  %s324_s29 = sshll.u32 %s870_s18, 4  ;;  %s325_s29 = int_to_ptr.vmem [resolvable:$true] %s324_s29 }
  0x6f   : > { %s322_s6 = scalar_lea.hbm %s927_s2, %s446_s20  ;;  %s312_s7 = scalar_lea.sflag [#allocation4], %s233_s4 }
  0x70   : > { %s326_s3 = sshll.u32 %s322_s6, 4  ;;  %s633_s14 = scalar_lea.hbm %s927_s2, 16  ;;  %s327_s3 = int_to_ptr.hbm [resolvable:$true] %s326_s3 }
  0x71   : > { %s627_s8 = sshra.s32 %s327_s3, 4  ;;  %s628_s8 = int_to_ptr.hbm [resolvable:$true] %s627_s8 }
  0x72   : > { %s629_s12 = scalar_lea.hbm %s628_s8, 8  ;;  %p634_p1 = scmp.lt.s32.totalorder %s628_s8, %s927_s2 }
  0x73   : > { %p630_p8 = scmp.ne.s32.totalorder %s628_s8, %s629_s12  ;;  %p635_p7 = scmp.lt.s32.totalorder %s633_s14, %s629_s12 }
  0x75   : > { %p631_p4 = pnand %p630_p8, %p806_p12  ;;  %p636_p9 = por %p635_p7, %p634_p1 }
  0x77   : > { %p632_p11 = pneg %p631_p4 }
  0x79   : > { %p637_p10 = pnand %p636_p9, %p632_p11 }
  0x7b   : > { %640 = shalt.err (!%p637_p10)
}
  0x7c   : > { %455 = dma.vmem_to_hbm [thread:$0]  (%p806_p12), %s325_s29, 128, %s327_s3, %s312_s7  }
  0x7d PF: > { %s338_s4 = sand.u32 1, %s692_s9   ;;  %p465_p3 = pnand %p431_p13, %p811_p0 }
  0x7e   : > { %s339_s17 = scalar_lea.sflag [#allocation4], %s338_s4 }
  0x7f   : > { %p466_p5 = pneg %p465_p3 }
  0x81   : > { %686 = dma.done.wait (%p466_p5), %s339_s17, 128  }
  0x82   : > { %688 = vsyncadd (%p466_p5), %s339_s17, 4294967168  ;;  %s21_s16 = sadd.s32 1, %s720_s16   ;;  %s934_s9 = smov %s696_s10 }
  0x83   : > { %p18_p6 = scmp.ge.s32.totalorder %s21_s16, 4   ;;  %s935_s10 = smov %s700_s11 }
  0x84   : > { %s936_s11 = smov %s800_s24  ;;  %s937_s12 = smov %s708_s13 }
  0x85   : > { %s915_s13 = smov 0   ;;  %s938_s14 = smov %s716_s15 }
  0x86   : > { %s939_s15 = smov %s941_s19  ;;  %20 = sbr.rel (!%p18_p6) target bundleno = 9 (0x9), region = 98 }
  0x8b   :  { %345 = vsyncpa [#allocation3], 1 }
  0x8c   :  { %347 = vsyncpa [#allocation3 + $0x1], 1 }
  0x8d   :  { %348 = vsyncpa [#allocation6], 1 }
  0x8e   :  { %350 = vsyncpa [#allocation6 + $0x1], 1 }
  0x8f   :  { %351 = vsyncpa [#allocation4], 1 }
  0x90   :  { %353 = vsyncpa [#allocation4 + $0x1], 1 }

</bundles_post_ra>
